<compile_context>
chip_gen: v6e
topology: v6e:2x2x1
jax: 0.10.0
libtpu: 0.0.40
codegen_flags: <defaults>
</compile_context>

<pallas_src>
import jax
import jax.numpy as jnp
from jax.experimental import pallas as pl
from jax.experimental.pallas import tpu as pltpu


def ocnn_kernel(data_ref, w1_ref, b1_ref, w2_ref, sc_ref, out_ref, hinge_ref):
    """One batch tile of the OC-NN forward pass.

    data_ref : (tile_rows, p*D)  p original rows packed per lane-dense row
    w1_ref   : (p*D, p*H)        block-diagonal W1^T (p copies)
    b1_ref   : (1, p*H)          b1 tiled p times
    w2_ref   : (p*H, p)          block-diagonal W2^T (column i reduces slot i)
    sc_ref   : (2,) SMEM         [r, b2]
    out_ref  : (tile_rows, p)    per-row fc2 outputs (packed order)
    hinge_ref: (1, p)            per-tile partial sums of relu(r - output)
    """
    r = sc_ref[0]
    b2 = sc_ref[1]

    x = data_ref[...]                                               # (T, p*D)
    pre = jnp.dot(x, w1_ref[...],
                  preferred_element_type=jnp.float32) + b1_ref[...]
    hidden = jax.nn.sigmoid(pre)                                    # (T, p*H), lane-dense

    # fc2 for all p packed slots at once: MXU matmul against the selector.
    out = jnp.dot(hidden, w2_ref[...],
                  preferred_element_type=jnp.float32) + b2          # (T, p)
    out_ref[...] = out

    # Hinge partial in the matmul's native layout: one sublane reduction.
    hinge = jnp.maximum(r - out, 0.0)
    hinge_ref[...] = jnp.sum(hinge, axis=0, keepdims=True)          # (1, p)


def ocnn_forward(data, fc1_w, fc1_b, fc2_w, fc2_b, r, nu, tile_n=32768):
    """fc1_w: (H, D), fc1_b: (H,), fc2_w: (1, H), fc2_b: (1,) — PyTorch shapes."""
    data = jnp.asarray(data, jnp.float32)
    fc1_w = jnp.asarray(fc1_w, jnp.float32)
    fc1_b = jnp.asarray(fc1_b, jnp.float32)
    fc2_w = jnp.asarray(fc2_w, jnp.float32)
    fc2_b_s = jnp.asarray(fc2_b, jnp.float32).reshape(())
    r_f = jnp.asarray(r, jnp.float32).reshape(())

    n, d = data.shape
    h = fc1_w.shape[0]

    # Lane packing factor: p original rows side-by-side along the 128-lane axis.
    p = 128 // d if (d < 128 and 128 % d == 0) else 1

    # --- tile sizing ---------------------------------------------------------
    # Keep tiles big (amortize ~0.35us per grid step) but always >= 2 tiles when
    # possible so v7x megacore uses both TensorCores.  tile rows stay a multiple
    # of 8*p so every block is (8,128)-aligned.
    row_align = 8 * p                                   # original rows per chunk
    chunks = int(pl.cdiv(n, row_align))
    max_chunks_per_tile = max(1, int(tile_n) // row_align)
    num_tiles = int(pl.cdiv(chunks, max_chunks_per_tile))
    if num_tiles == 1 and chunks >= 2:
        num_tiles = 2
    chunks_per_tile = int(pl.cdiv(chunks, num_tiles))
    tile_rows = chunks_per_tile * 8                     # packed rows per tile
    n_pad = num_tiles * tile_rows * p                   # original rows, padded

    # --- wrapper-side prep (all cheap / free) --------------------------------
    data_p = data if n_pad == n else jnp.pad(data, ((0, n_pad - n), (0, 0)))
    data_p = data_p.reshape(n_pad // p, p * d)          # free row-major reshape

    eye = jnp.eye(p, dtype=jnp.float32)
    w1_bd = jnp.kron(eye, fc1_w.T)                      # (p*D, p*H) block-diag
    b1_t = jnp.tile(fc1_b.reshape(1, h), (1, p))        # (1, p*H)
    w2_bd = jnp.kron(eye, fc2_w.reshape(h, 1))          # (p*H, p)

    scalars = jnp.stack([r_f, fc2_b_s])                 # (2,) f32 in SMEM

    smem = pltpu.MemorySpace.SMEM
    out_p, hinge_part = pl.pallas_call(
        ocnn_kernel,
        grid=(num_tiles,),
        in_specs=[
            pl.BlockSpec((tile_rows, p * d), lambda i: (i, 0)),      # data tile
            pl.BlockSpec((p * d, p * h), lambda i: (0, 0)),          # W1^T block-diag
            pl.BlockSpec((1, p * h), lambda i: (0, 0)),              # b1 tiled
            pl.BlockSpec((p * h, p), lambda i: (0, 0)),              # W2^T block-diag
            pl.BlockSpec((2,), lambda i: (0,), memory_space=smem),   # [r, b2]
        ],
        out_specs=(
            pl.BlockSpec((tile_rows, p), lambda i: (i, 0)),          # packed outputs
            pl.BlockSpec((1, p), lambda i: (i, 0)),                  # hinge partials
        ),
        out_shape=(
            jax.ShapeDtypeStruct((n_pad // p, p), jnp.float32),
            jax.ShapeDtypeStruct((num_tiles, p), jnp.float32),
        ),
        compiler_params=pltpu.CompilerParams(
            dimension_semantics=("parallel",)),
    )(data_p, w1_bd, b1_t, w2_bd, scalars)

    # Packed (N_pad/p, p) -> (N, 1): consecutive packing keeps row-major order.
    output = out_p.reshape(n_pad)[:n].reshape(n, 1)

    # Padded rows all carry data == 0, so each contributes the SAME hinge value;
    # subtract it here instead of masking per-element inside the kernel.
    pad_out = jnp.dot(fc2_w.reshape(-1), jax.nn.sigmoid(fc1_b)) + fc2_b_s
    pad_hinge = jnp.maximum(r_f - pad_out, 0.0)
    hinge_sum = jnp.sum(hinge_part) - (n_pad - n) * pad_hinge

    obj = (0.5 * jnp.sqrt(jnp.sum(fc1_w * fc1_w))
           + 0.5 * jnp.sqrt(jnp.sum(fc2_w * fc2_w))
           + (1.0 / nu) * hinge_sum / n
           - r_f)
    return output, obj


def reference_forward(data, fc1_w, fc1_b, fc2_w, fc2_b, r, nu):
    hidden = jax.nn.sigmoid(data @ fc1_w.T + fc1_b)
    output = hidden @ fc2_w.T + fc2_b
    t1 = 0.5 * jnp.linalg.norm(fc1_w)
    t2 = 0.5 * jnp.linalg.norm(fc2_w)
    t3 = (1.0 / nu) * jnp.mean(jnp.maximum(r - output, 0.0))
    return output, t1 + t2 + t3 - r


if __name__ == "__main__":
    r = 0.3
    nu = 0.1

    key = jax.random.PRNGKey(0)
    k_d1, k_d2, k_w1, k_b1, k_w2, k_b2, k_d3, k_w3, k_b3, k_w4, k_b4 = \
        jax.random.split(key, 11)

    # PyTorch-shaped parameters: fc1.weight (H, D), fc1.bias (H,),
    # fc2.weight (1, H), fc2.bias (1,)
    input_size, hidden_size = 32, 32
    fc1_w = jax.random.normal(k_w1, (hidden_size, input_size), jnp.float32) * 0.1
    fc1_b = jax.random.normal(k_b1, (hidden_size,), jnp.float32) * 0.1
    fc2_w = jax.random.normal(k_w2, (1, hidden_size), jnp.float32) * 0.1
    fc2_b = jax.random.normal(k_b2, (1,), jnp.float32) * 0.1

    # --- Test 1: small batch (single tile, lane-packed, padded rows) ---
    batch = 8
    data = jax.random.normal(k_d1, (batch, input_size), jnp.float32)
    out, obj = ocnn_forward(data, fc1_w, fc1_b, fc2_w, fc2_b, r, nu)
    jax.block_until_ready((out, obj))
    ref_out, ref_obj = reference_forward(data, fc1_w, fc1_b, fc2_w, fc2_b, r, nu)
    assert out.shape == (batch, 1)
    assert jnp.allclose(out, ref_out, atol=3e-5), "output mismatch (batch=8)"
    assert jnp.allclose(obj, ref_obj, atol=3e-5), "objective mismatch (batch=8)"

    # --- Test 2: multi-tile grid (batch not a multiple of the tile) ---
    batch2 = 300
    data2 = jax.random.normal(k_d2, (batch2, input_size), jnp.float32)
    out2, obj2 = ocnn_forward(data2, fc1_w, fc1_b, fc2_w, fc2_b, r, nu, tile_n=64)
    jax.block_until_ready((out2, obj2))
    ref_out2, ref_obj2 = reference_forward(data2, fc1_w, fc1_b, fc2_w, fc2_b, r, nu)
    assert out2.shape == (batch2, 1)
    assert jnp.allclose(out2, ref_out2, atol=3e-5), "output mismatch (batch=300)"
    assert jnp.allclose(obj2, ref_obj2, atol=3e-5), "objective mismatch (batch=300)"

    # --- Test 3: p=1 fallback path (D does not divide 128) ---
    in3, hid3, batch3 = 40, 24, 50
    fc1_w3 = jax.random.normal(k_w3, (hid3, in3), jnp.float32) * 0.1
    fc1_b3 = jax.random.normal(k_b3, (hid3,), jnp.float32) * 0.1
    fc2_w3 = jax.random.normal(k_w4, (1, hid3), jnp.float32) * 0.1
    fc2_b3 = jax.random.normal(k_b4, (1,), jnp.float32) * 0.1
    data3 = jax.random.normal(k_d3, (batch3, in3), jnp.float32)
    out3, obj3 = ocnn_forward(data3, fc1_w3, fc1_b3, fc2_w3, fc2_b3, r, nu)
    jax.block_until_ready((out3, obj3))
    ref_out3, ref_obj3 = reference_forward(data3, fc1_w3, fc1_b3, fc2_w3, fc2_b3, r, nu)
    assert out3.shape == (batch3, 1)
    assert jnp.allclose(out3, ref_out3, atol=3e-5), "output mismatch (p=1 path)"
    assert jnp.allclose(obj3, ref_obj3, atol=3e-5), "objective mismatch (p=1 path)"

    print("KERNEL_OK")
</pallas_src>

<mosaic_0001>
module attributes {stable_mosaic.version = 11 : i64} {
  func.func @ocnn_kernel(%arg0: i32, %arg1: memref<8x128xf32, #tpu.memory_space<vmem>>, %arg2: memref<128x128xf32, #tpu.memory_space<vmem>>, %arg3: memref<1x128xf32, #tpu.memory_space<vmem>>, %arg4: memref<128x4xf32, #tpu.memory_space<vmem>>, %arg5: memref<2xf32, #tpu.memory_space<smem>>, %arg6: memref<8x4xf32, #tpu.memory_space<vmem>>, %arg7: memref<1x4xf32, #tpu.memory_space<vmem>>) attributes {dimension_semantics = [#tpu.dimension_semantics<parallel>], iteration_bounds = array<i64: 1>, scalar_prefetch = 0 : i64, scratch_operands = 0 : i64, tpu.core_type = #tpu.core_type<tc>, window_params = [{transform_indices = @transform_0, window_bounds = array<i64: 8, 128>}, {pipeline_mode = #tpu.pipeline_mode<synchronous>, transform_indices = @transform_1, window_bounds = array<i64: 128, 128>}, {pipeline_mode = #tpu.pipeline_mode<synchronous>, transform_indices = @transform_2, window_bounds = array<i64: 1, 128>}, {pipeline_mode = #tpu.pipeline_mode<synchronous>, transform_indices = @transform_3, window_bounds = array<i64: 128, 4>}, {transform_indices = @transform_4, window_bounds = array<i64: 2>}, {transform_indices = @transform_5, window_bounds = array<i64: 8, 4>}, {transform_indices = @transform_6, window_bounds = array<i64: 1, 4>}]} {
    %c0 = arith.constant 0 : index
    %0 = memref.load %arg5[%c0] : memref<2xf32, #tpu.memory_space<smem>>
    %c1 = arith.constant 1 : index
    %1 = memref.load %arg5[%c1] : memref<2xf32, #tpu.memory_space<smem>>
    %c0_0 = arith.constant 0 : index
    %c0_1 = arith.constant 0 : index
    %2 = vector.load %arg1[%c0_0, %c0_1] : memref<8x128xf32, #tpu.memory_space<vmem>>, vector<8x128xf32>
    %c0_2 = arith.constant 0 : index
    %c0_3 = arith.constant 0 : index
    %3 = vector.load %arg2[%c0_2, %c0_3] : memref<128x128xf32, #tpu.memory_space<vmem>>, vector<128x128xf32>
    %cst = arith.constant dense<0.000000e+00> : vector<8x128xf32>
    %4 = tpu.matmul %2, %3, %cst {dimension_numbers = #tpu.dot_dimension_numbers<[1], [0], [0], [1], [0, 0, 1, 1], [], []>} : vector<8x128xf32>, vector<128x128xf32>, vector<8x128xf32> -> vector<8x128xf32>
    %c0_4 = arith.constant 0 : index
    %c0_5 = arith.constant 0 : index
    %5 = vector.load %arg3[%c0_4, %c0_5] : memref<1x128xf32, #tpu.memory_space<vmem>>, vector<1x128xf32>
    %6 = vector.broadcast %5 : vector<1x128xf32> to vector<8x128xf32>
    %7 = arith.addf %4, %6 : vector<8x128xf32>
    %8 = arith.negf %7 : vector<8x128xf32>
    %9 = math.exp %8 : vector<8x128xf32>
    %cst_6 = arith.constant 1.000000e+00 : f32
    %10 = vector.broadcast %cst_6 : f32 to vector<8x128xf32>
    %11 = arith.addf %10, %9 : vector<8x128xf32>
    %12 = arith.divf %10, %11 : vector<8x128xf32>
    %c0_7 = arith.constant 0 : index
    %c0_8 = arith.constant 0 : index
    %13 = vector.load %arg4[%c0_7, %c0_8] : memref<128x4xf32, #tpu.memory_space<vmem>>, vector<128x4xf32>
    %cst_9 = arith.constant dense<0.000000e+00> : vector<8x4xf32>
    %14 = tpu.matmul %12, %13, %cst_9 {dimension_numbers = #tpu.dot_dimension_numbers<[1], [0], [0], [1], [0, 0, 1, 1], [], []>} : vector<8x128xf32>, vector<128x4xf32>, vector<8x4xf32> -> vector<8x4xf32>
    %15 = vector.broadcast %1 : f32 to vector<8x4xf32>
    %16 = arith.addf %14, %15 : vector<8x4xf32>
    %c0_10 = arith.constant 0 : index
    %c0_11 = arith.constant 0 : index
    %17 = vector.load %arg6[%c0_10, %c0_11] : memref<8x4xf32, #tpu.memory_space<vmem>>, vector<8x4xf32>
    tpu.vector_store %arg6[%c0_10, %c0_11], %16 {strides = array<i32>} : memref<8x4xf32, #tpu.memory_space<vmem>>, vector<8x4xf32>,
    %18 = vector.broadcast %0 : f32 to vector<8x4xf32>
    %19 = arith.subf %18, %16 : vector<8x4xf32>
    %cst_12 = arith.constant 0.000000e+00 : f32
    %20 = vector.broadcast %cst_12 : f32 to vector<8x4xf32>
    %21 = arith.maximumf %19, %20 : vector<8x4xf32>
    %cst_13 = arith.constant dense<0.000000e+00> : vector<4xf32>
    %22 = vector.multi_reduction <add>, %21, %cst_13 [0] : vector<8x4xf32> to vector<4xf32>
    %23 = vector.shape_cast %22 : vector<4xf32> to vector<1x4xf32>
    %c0_14 = arith.constant 0 : index
    %c0_15 = arith.constant 0 : index
    %24 = vector.load %arg7[%c0_14, %c0_15] : memref<1x4xf32, #tpu.memory_space<vmem>>, vector<1x4xf32>
    tpu.vector_store %arg7[%c0_14, %c0_15], %23 {strides = array<i32>} : memref<1x4xf32, #tpu.memory_space<vmem>>, vector<1x4xf32>,
    return
  }
  func.func @transform_0(%arg0: i32) -> (i32, i32) {
    %c0_i32 = arith.constant 0 : i32
    %c0_i32_0 = arith.constant 0 : i32
    return %arg0, %c0_i32 : i32, i32
  }
  func.func @transform_1(%arg0: i32) -> (i32, i32) {
    %c0_i32 = arith.constant 0 : i32
    %c0_i32_0 = arith.constant 0 : i32
    %c0_i32_1 = arith.constant 0 : i32
    return %c0_i32, %c0_i32_0 : i32, i32
  }
  func.func @transform_2(%arg0: i32) -> (i32, i32) {
    %c0_i32 = arith.constant 0 : i32
    %c0_i32_0 = arith.constant 0 : i32
    %c0_i32_1 = arith.constant 0 : i32
    return %c0_i32, %c0_i32_0 : i32, i32
  }
  func.func @transform_3(%arg0: i32) -> (i32, i32) {
    %c0_i32 = arith.constant 0 : i32
    %c0_i32_0 = arith.constant 0 : i32
    %c0_i32_1 = arith.constant 0 : i32
    return %c0_i32, %c0_i32_0 : i32, i32
  }
  func.func @transform_4(%arg0: i32) -> i32 {
    %c0_i32 = arith.constant 0 : i32
    %c0_i32_0 = arith.constant 0 : i32
    return %c0_i32 : i32
  }
  func.func @transform_5(%arg0: i32) -> (i32, i32) {
    %c0_i32 = arith.constant 0 : i32
    %c0_i32_0 = arith.constant 0 : i32
    return %arg0, %c0_i32 : i32, i32
  }
  func.func @transform_6(%arg0: i32) -> (i32, i32) {
    %c0_i32 = arith.constant 0 : i32
    %c0_i32_0 = arith.constant 0 : i32
    return %arg0, %c0_i32 : i32, i32
  }
}

</mosaic_0001>

<bundles_post_ra>
// kernel: tpu_custom_call.1
= control target key start
LH: loop header
LB: loop body
LE: loop exit
PB: predicated region body
PF: predicated region fallthrough
CT: control target
= control target key end

     0   :  { %12 = vsyncpa [#allocation3], 0  ;;  %s630_s0 = inlined_call_operand.hbm [shape: f32[8,128], index: 0, kind: input, shape index: {}]   ;;  %s631_s1 = inlined_call_operand.vmem [shape: f32[128,128], index: 1, kind: input, shape index: {}]   ;;  %s632_s2 = inlined_call_operand.vmem [shape: f32[1,128], index: 2, kind: input, shape index: {}]   ;;  %s633_s3 = inlined_call_operand.vmem [shape: f32[128,4], index: 3, kind: input, shape index: {}]   ;;  %s634_s4 = inlined_call_operand.vmem [shape: f32[2], index: 4, kind: input, shape index: {}]   ;;  %s635_s5 = inlined_call_operand.vmem [shape: f32[8,4], index: 5, kind: output, shape index: {0}]   ;;  %s636_s6 = inlined_call_operand.hbm [shape: f32[1,4], index: 6, kind: output, shape index: {1}]  }
   0x1   :  { %13 = vsyncpa [#allocation5], 0 }
   0x2   :  { %14 = vsyncpa [#allocation4], 0  ;;  %s37_s23 = sshll.u32 %s634_s4, 4  ;;  %s445_s24 = smov [#allocation2]   ;;  %s38_s23 = int_to_ptr.vmem [resolvable:$true] %s37_s23 }
   0x3   :  { %s21_s25 = sshll.u32 %s445_s24, 4  ;;  %s22_s25 = int_to_ptr.vmem [resolvable:$true] %s21_s25 }
   0x4   :  { %s395_s26 = scalar_lea.vmem %s22_s25, 128  ;;  %p400_p1 = scmp.lt.s32.totalorder %s22_s25, %s22_s25 }
   0x5   :  { %p396_p0 = scmp.ne.s32.totalorder %s22_s25, %s395_s26  ;;  %p401_p2 = scmp.lt.s32.totalorder %s395_s26, %s395_s26 }
   0x7   :  { %p402_p3 = por %p401_p2, %p400_p1 }
   0x9   :  { %p403_p4 = pnand %p402_p3, %p396_p0 }
   0xb   :  { %406 = shalt.err (!%p403_p4)
}
   0xc   :  { %24 = dma.hbm_to_vmem [thread:$0]  %s630_s0, 128, %s22_s25, [#allocation3]  }
   0xd   :  { %s407_s29 = scalar_lea.vmem %s38_s23, 16  ;;  %p412_p6 = scmp.lt.s32.totalorder %s38_s23, %s38_s23 }
   0xe   :  { %p408_p5 = scmp.ne.s32.totalorder %s38_s23, %s407_s29  ;;  %p413_p7 = scmp.lt.s32.totalorder %s407_s29, %s407_s29 }
  0x10   :  { %p414_p8 = por %p413_p7, %p412_p6 }
  0x12   :  { %p415_p9 = pnand %p414_p8, %p408_p5 }
  0x14   :  { %418 = shalt.err (!%p415_p9)
}
  0x15   :  { %s446_s4 = smov [#allocation6]  }
  0x16   :  { %40 = dma.vmem_to_smem %s38_s23, 16, %s446_s4, [#allocation5]  }
  0x17   :  { %439 = dma.done.wait [#allocation3], 128  }
  0x18   :  { %440 = vsyncadd [#allocation3], 4294967168 }
  0x19   :  { %441 = dma.done.wait [#allocation5], 16  }
  0x1a   :  { %442 = vsyncadd [#allocation5], 4294967280 }
  0x1b   :  { %47 = sfence }
  0x1c   :  { %v66_v0 = vld [vmem:[%s631_s1 + $0x78] sm:$0xff]  ;;  %v447_v1 = vmov 0.0   ;;  %v65_v2 = vld [vmem:[%s631_s1 + $0x70] sm:$0xff]  ;;  %vm448_vm0 = vmmov 0   ;;  %v64_v3 = vld [vmem:[%s631_s1 + $0x68] sm:$0xff]  ;;  %s271_s17 = sld [smem:[#allocation6 + $0x1]] }
  0x1d   :  { %308 = vmatprep.subr.mxu0 %v447_v1  ;;  %340 = vmatprep.mubr.msk.f32.mxu0 %vm448_vm0, %v447_v1  ;;  %v63_v4 = vld [vmem:[%s631_s1 + $0x60] sm:$0xff]  ;;  %v62_v5 = vld [vmem:[%s631_s1 + $0x58] sm:$0xff]  ;;  %v61_v6 = vld [vmem:[%s631_s1 + $0x50] sm:$0xff]  ;;  %vm237_vm1 = vcmask 31744   ;;  %s449_s19 = smov [#allocation7]   ;;  %vm249_vm2 = vcmask 24576  }
  0x1e   :  { %309 = vmatpush3.msra.mxu0 %v66_v0  ;;  %343 = vmatprep.subr.mxu1 %v447_v1  ;;  %v60_v7 = vld [vmem:[%s631_s1 + $0x48] sm:$0xff]  ;;  %v59_v8 = vld [vmem:[%s631_s1 + $0x40] sm:$0xff]  ;;  %v58_v9 = vld [vmem:[%s631_s1 + $0x38] sm:$0xff]  ;;  %s259_s20 = sshll.u32 %s449_s19, 4  ;;  %s260_s20 = int_to_ptr.vmem [resolvable:$true] %s259_s20 }
  0x1f   :  { %310 = vmatprep.subr.mxu0 %v447_v1  ;;  %375 = vmatprep.mubr.msk.f32.mxu1 %vm448_vm0, %v447_v1  ;;  %v57_v10 = vld [vmem:[%s631_s1 + $0x30] sm:$0xff]  ;;  %v56_v11 = vld [vmem:[%s631_s1 + $0x28] sm:$0xff]  ;;  %v55_v12 = vld [vmem:[%s631_s1 + $0x20] sm:$0xff]  ;;  %s419_s21 = scalar_lea.vmem %s260_s20, 16  ;;  %s423_s22 = scalar_lea.vmem %s260_s20, 32 }
  0x20   :  { %311 = vmatpush3.msra.mxu0 %v65_v2  ;;  %v54_v13 = vld [vmem:[%s631_s1 + $0x18] sm:$0xff]  ;;  %v53_v14 = vld [vmem:[%s631_s1 + $0x10] sm:$0xff]  ;;  %v52_v15 = vld [vmem:[%s631_s1 + $0x8] sm:$0xff]  ;;  %p420_p10 = scmp.ne.s32.totalorder %s260_s20, %s419_s21  ;;  %p424_p11 = scmp.lt.s32.totalorder %s260_s20, %s260_s20 }
  0x21   :  { %312 = vmatprep.subr.mxu0 %v447_v1  ;;  %v51_v16 = vld [vmem:[%s631_s1] sm:$0xff]  ;;  %v165_v18 = vld [vmem:[%s633_s3 + $0x78] sm:$0xff]  ;;  %v164_v19 = vld [vmem:[%s633_s3 + $0x70] sm:$0xff]  ;;  %p425_p12 = scmp.lt.s32.totalorder %s423_s22, %s419_s21 }
  0x22   :  { %313 = vmatpush3.msra.mxu0 %v64_v3  ;;  %v50_v17 = vld [vmem:[#allocation2] sm:$0xff]  ;;  %344 = vmatpush3.msra.mxu1 %v165_v18  ;;  %v163_v20 = vld [vmem:[%s633_s3 + $0x68] sm:$0xff]  ;;  %v161_v22 = vld [vmem:[%s633_s3 + $0x58] sm:$0xff]  ;;  %v166_v42 = vstv %s271_s17 }
  0x23   :  { %314 = vmatprep.subr.mxu0 %v447_v1  ;;  %345 = vmatprep.subr.mxu1 %v447_v1  ;;  %v162_v21 = vld [vmem:[%s633_s3 + $0x60] sm:$0xff]  ;;  %v160_v23 = vld [vmem:[%s633_s3 + $0x50] sm:$0xff]  ;;  %v159_v24 = vld [vmem:[%s633_s3 + $0x48] sm:$0xff]  ;;  %p426_p13 = por %p425_p12, %p424_p11 }
  0x24   :  { %315 = vmatpush3.msra.mxu0 %v63_v4  ;;  %346 = vmatpush3.msra.mxu1 %v164_v19  ;;  %v158_v25 = vld [vmem:[%s633_s3 + $0x40] sm:$0xff]  ;;  %v157_v26 = vld [vmem:[%s633_s3 + $0x38] sm:$0xff]  ;;  %v156_v27 = vld [vmem:[%s633_s3 + $0x30] sm:$0xff] }
  0x25   :  { %316 = vmatprep.subr.mxu0 %v447_v1  ;;  %347 = vmatprep.subr.mxu1 %v447_v1  ;;  %v155_v28 = vld [vmem:[%s633_s3 + $0x28] sm:$0xff]  ;;  %v154_v29 = vld [vmem:[%s633_s3 + $0x20] sm:$0xff]  ;;  %v153_v30 = vld [vmem:[%s633_s3 + $0x18] sm:$0xff]  ;;  %p427_p0 = pnand %p426_p13, %p420_p10 }
  0x26   :  { %317 = vmatpush3.msra.mxu0 %v62_v5  ;;  %348 = vmatpush3.msra.mxu1 %v163_v20  ;;  %v152_v31 = vld [vmem:[%s633_s3 + $0x10] sm:$0xff]  ;;  %v151_v32 = vld [vmem:[%s633_s3 + $0x8] sm:$0xff]  ;;  %v150_v33 = vld [vmem:[%s633_s3] sm:$0xff]  ;;  %s48_s3 = sld [smem:[#allocation6]] }
  0x27   :  { %318 = vmatprep.subr.mxu0 %v447_v1  ;;  %349 = vmatprep.subr.mxu1 %v447_v1  ;;  %v272_v34 = vld [vmem:[%s632_s2] ss:$0 sm:$0xff] }
  0x28   :  { %319 = vmatpush3.msra.mxu0 %v61_v6  ;;  %350 = vmatpush3.msra.mxu1 %v162_v21 }
  0x29   :  { %320 = vmatprep.subr.mxu0 %v447_v1  ;;  %351 = vmatprep.subr.mxu1 %v447_v1 }
  0x2a   :  { %321 = vmatpush3.msra.mxu0 %v60_v7  ;;  %352 = vmatpush3.msra.mxu1 %v161_v22 }
  0x2b   :  { %322 = vmatprep.subr.mxu0 %v447_v1  ;;  %353 = vmatprep.subr.mxu1 %v447_v1 }
  0x2c   :  { %323 = vmatpush3.msra.mxu0 %v59_v8  ;;  %354 = vmatpush3.msra.mxu1 %v160_v23  ;;  %v239_v44 = vstv %s48_s3 }
  0x2d   :  { %324 = vmatprep.subr.mxu0 %v447_v1  ;;  %355 = vmatprep.subr.mxu1 %v447_v1 }
  0x2e   :  { %325 = vmatpush3.msra.mxu0 %v58_v9  ;;  %356 = vmatpush3.msra.mxu1 %v159_v24 }
  0x2f   :  { %326 = vmatprep.subr.mxu0 %v447_v1  ;;  %357 = vmatprep.subr.mxu1 %v447_v1 }
  0x30   :  { %327 = vmatpush3.msra.mxu0 %v57_v10  ;;  %358 = vmatpush3.msra.mxu1 %v158_v25 }
  0x31   :  { %328 = vmatprep.subr.mxu0 %v447_v1  ;;  %359 = vmatprep.subr.mxu1 %v447_v1 }
  0x32   :  { %329 = vmatpush3.msra.mxu0 %v56_v11  ;;  %360 = vmatpush3.msra.mxu1 %v157_v26 }
  0x33   :  { %330 = vmatprep.subr.mxu0 %v447_v1  ;;  %361 = vmatprep.subr.mxu1 %v447_v1 }
  0x34   :  { %331 = vmatpush3.msra.mxu0 %v55_v12  ;;  %362 = vmatpush3.msra.mxu1 %v156_v27 }
  0x35   :  { %332 = vmatprep.subr.mxu0 %v447_v1  ;;  %363 = vmatprep.subr.mxu1 %v447_v1 }
  0x36   :  { %333 = vmatpush3.msra.mxu0 %v54_v13  ;;  %364 = vmatpush3.msra.mxu1 %v155_v28 }
  0x37   :  { %334 = vmatprep.subr.mxu0 %v447_v1  ;;  %365 = vmatprep.subr.mxu1 %v447_v1 }
  0x38   :  { %335 = vmatpush3.msra.mxu0 %v53_v14  ;;  %366 = vmatpush3.msra.mxu1 %v154_v29 }
  0x39   :  { %336 = vmatprep.subr.mxu0 %v447_v1  ;;  %367 = vmatprep.subr.mxu1 %v447_v1 }
  0x3a   :  { %337 = vmatpush3.msra.mxu0 %v52_v15  ;;  %368 = vmatpush3.msra.mxu1 %v153_v30 }
  0x3b   :  { %338 = vmatprep.subr.mxu0 %v447_v1  ;;  %369 = vmatprep.subr.mxu1 %v447_v1 }
  0x3c   :  { %339 = vmatpush3.msra.mxu0 %v51_v16  ;;  %370 = vmatpush3.msra.mxu1 %v152_v31 }
  0x3d   :  { %341 = vmatmul.mubr.f32.vlgmr.msra.gmra.mxu0 %v50_v17  ;;  %371 = vmatprep.subr.mxu1 %v447_v1 }
  0x3e   :  { %372 = vmatpush3.msra.mxu1 %v151_v32 }
  0x3f   :  { %373 = vmatprep.subr.mxu1 %v447_v1 }
  0x40   :  { %374 = vmatpush3.msra.mxu1 %v150_v33 }
  0xfd   :  { %v140_v35 = vpop.f32.mrf.mxu0 }
  0xfe   :  { %v141_v36 = vadd.f32 %v272_v34, %v140_v35 }
  0xff   :  { %v342_v37 = vpop.f32.mrf.mxu0 }
 0x100   :  { %v273_v38 = vmul.f32 -1.442695, %v141_v36 }
 0x102   :  { %383 = vpow2.f32 %v273_v38 }
 0x10f   :  { %v384_v39 = vpop.eup %383 }
 0x110   :  { %v147_v40 = vadd.f32 1.0, %v384_v39 }
 0x112   :  { %385 = vrcp.f32 %v147_v40 }
 0x11f   :  { %v386_v41 = vpop.eup %385 }
 0x120   :  { %376 = vmatmul.mubr.f32.vlgmr.msra.gmra.mxu1 %v386_v41 }
 0x1e0   :  { %v233_v43 = vpop.f32.mrf.mxu1 }
 0x1e1   :  { %v234_v45 = vadd.f32 %v233_v43, %v166_v42 }
 0x1e2   :  { %v377_v46 = vpop.f32.mrf.mxu1 }
 0x1e3   :  { %238 = vst.msk [vmem:[%s635_s5] sm:$0xff] %vm237_vm1, %v234_v45  ;;  %v240_v47 = vsub.f32 %v239_v44, %v234_v45 }
 0x1e5   :  { %v241_v48 = vmax.f32 %v240_v47, 0.0 }
 0x1e7   :  { %v242_v49 = vsel %vm237_vm1, %v241_v48, 0.0 }
 0x1e8   :  { %v243_v50 = vrot.slane %v242_v49, 4 }
 0x1ea   :  { %v244_v51 = vadd.f32 %v243_v50, %v242_v49 }
 0x1ec   :  { %v245_v52 = vrot.slane %v244_v51, 2 }
 0x1ee   :  { %v246_v53 = vadd.f32 %v245_v52, %v244_v51 }
 0x1f0   :  { %v247_v54 = vrot.slane %v246_v53, 1 }
 0x1f2   :  { %v248_v55 = vadd.f32 %v247_v54, %v246_v53 }
 0x1f4   :  { %250 = vst.msk [vmem:[#allocation7] sm:$0x1] %vm249_vm2, %v248_v55 }
 0x1f5   :  { %430 = shalt.err (!%p427_p0)
}
 0x1f6   :  { %262 = dma.vmem_to_hbm [thread:$0]  %s260_s20, 16, %s636_s6, [#allocation4]  }
 0x1f7   :  { %443 = dma.done.wait [#allocation4], 16  }
 0x1f8   :  { %444 = vsyncadd [#allocation4], 4294967280 }
 0x1f9   :  { %268 = vsyncpa [#allocation3], 1 }
 0x1fa   :  { %269 = vsyncpa [#allocation4], 1 }
 0x1fb   :  { %270 = vsyncpa [#allocation5], 1 }

</bundles_post_ra>
